<compile_context>
chip_gen: v7x
topology: tpu7x:2x2x1
jax: 0.10.0
libtpu: 0.0.40
codegen_flags: <defaults>
</compile_context>

<pallas_src>
import functools

import jax
import jax.numpy as jnp
from jax.experimental import pallas as pl
from jax.experimental.pallas import tpu as pltpu


_LANE = 128
_VMEM_BUDGET = 28 * 1024 * 1024        # conservative working-set target (all gens)
_VMEM_LIMIT_CAP = 48 * 1024 * 1024     # v7x: 64 MiB physical VMEM per TensorCore


def _round_up(x, m):
    return ((x + m - 1) // m) * m


def _cdiv(a, b):
    return -(-a // b)


def _vmem_limit(need_bytes):
    return int(min(max(2 * need_bytes, 16 * 1024 * 1024), _VMEM_LIMIT_CAP))


# ---------------------------------------------------------------------------
# Kernel 1: support = x @ W     (row-tiled, computed exactly once)
# ---------------------------------------------------------------------------
def _support_kernel(x_ref, w_ref, o_ref):
    x = x_ref[...].astype(w_ref.dtype)
    o_ref[...] = jnp.dot(
        x, w_ref[...], preferred_element_type=jnp.float32
    ).astype(o_ref.dtype)


# ---------------------------------------------------------------------------
# Kernel 2a (resident): out = relu(adj @ support), support fully VMEM-resident
# (constant index_map -> fetched once).  adj arrives in its native dtype and
# is cast in-kernel; no accumulator scratch is needed (single K step).
# ---------------------------------------------------------------------------
def _fused_resident_kernel(adj_ref, sup_ref, o_ref):
    a = adj_ref[...].astype(sup_ref.dtype)
    acc = jnp.dot(a, sup_ref[...], preferred_element_type=jnp.float32)
    o_ref[...] = jnp.maximum(acc, 0.0).astype(o_ref.dtype)


# ---------------------------------------------------------------------------
# Kernel 2b (tiled): grid = (row tiles, f_out tiles, K tiles); resident f32
# accumulator with pl.when init/finalize; ReLU fused; ragged K tail masked
# in-kernel so adj never needs padding in HBM.
# ---------------------------------------------------------------------------
def _fused_tiled_kernel(adj_ref, sup_ref, o_ref, acc_ref, *, n_cols, block_k):
    k = pl.program_id(2)

    @pl.when(k == 0)
    def _():
        acc_ref[...] = jnp.zeros_like(acc_ref)

    a = adj_ref[...]
    if n_cols % block_k != 0:
        # Zero adjacency columns past the true node count on the ragged tile
        # (the matching padded support rows are exact zeros as well).
        col = jax.lax.broadcasted_iota(jnp.int32, a.shape, 1) + k * block_k
        a = jnp.where(col < n_cols, a, jnp.zeros_like(a))

    acc_ref[...] += jnp.dot(
        a.astype(sup_ref.dtype), sup_ref[...], preferred_element_type=jnp.float32
    )

    @pl.when(k == pl.num_programs(2) - 1)
    def _():
        o_ref[...] = jnp.maximum(acc_ref[...], 0.0).astype(o_ref.dtype)


# ---------------------------------------------------------------------------
# support = x @ W_padded wrapper
# ---------------------------------------------------------------------------
def _compute_support(x, weight_p, *, compute_dtype):
    rows, f_in = x.shape
    f_out_p = weight_p.shape[1]
    sup_item = jnp.dtype(compute_dtype).itemsize

    def need(b):
        return (2 * b * f_in * x.dtype.itemsize
                + 2 * f_in * f_out_p * weight_p.dtype.itemsize
                + 2 * b * f_out_p * sup_item)

    bm = min(512, _round_up(rows, _LANE))
    while bm > _LANE and need(bm) > _VMEM_BUDGET:
        bm = max(_LANE, bm // 2)
    # TODO(synk): very large weights (f_in * f_out_p * 2B > VMEM budget) would
    # need an extra K/N tiling level in this kernel.

    return pl.pallas_call(
        _support_kernel,
        out_shape=jax.ShapeDtypeStruct((rows, f_out_p), compute_dtype),
        grid=(_cdiv(rows, bm),),
        in_specs=[
            pl.BlockSpec((bm, f_in), lambda i: (i, 0)),
            pl.BlockSpec((f_in, f_out_p), lambda i: (0, 0)),
        ],
        out_specs=pl.BlockSpec((bm, f_out_p), lambda i: (i, 0)),
        compiler_params=pltpu.CompilerParams(
            dimension_semantics=("parallel",),
            vmem_limit_bytes=_vmem_limit(need(bm)),
        ),
        cost_estimate=pl.CostEstimate(
            flops=2 * rows * f_in * f_out_p,
            transcendentals=0,
            bytes_accessed=(x.size * x.dtype.itemsize
                            + weight_p.size * weight_p.dtype.itemsize
                            + rows * f_out_p * sup_item),
        ),
    )(x, weight_p)


# ---------------------------------------------------------------------------
# Public entry point
# ---------------------------------------------------------------------------
def graph_convolution(
    x,
    adj,
    weight,
    dropout=0.0,
    training=False,
    *,
    compute_dtype=jnp.bfloat16,
    block_m=None,
    block_k=None,
    block_n=None,
):
    """Pallas implementation of GraphConvolution.forward (act=relu).

    x: (N, F_in), adj: (N, N) [any float dtype, streamed as-is], weight:
    (F_in, F_out) -> (N, F_out).
    """
    if training and dropout > 0.0:
        # TODO(synk): training-mode dropout needs pltpu.prng_seed /
        # pltpu.prng_random_bits; only the inference path is implemented.
        raise NotImplementedError("GraphConvolution Pallas kernel: inference only")

    n, f_in = x.shape
    if adj.shape != (n, n):
        raise ValueError(f"adj must be ({n}, {n}), got {adj.shape}")
    f_out = weight.shape[1]
    out_dtype = x.dtype
    cdt = jnp.dtype(compute_dtype)

    f_out_p = _round_up(f_out, _LANE)
    adj_item = jnp.dtype(adj.dtype).itemsize
    out_item = jnp.dtype(out_dtype).itemsize
    sup_item = cdt.itemsize

    # weight is tiny: pad f_out to a lane multiple (lane-dense stores) + cast.
    weight_p = jnp.pad(weight.astype(cdt), ((0, 0), (0, f_out_p - f_out)))

    # Keep >= 2 row tiles when possible so the "parallel" row axis feeds both
    # TensorCores on v7x megacore.
    bm_cap = max(_LANE, _round_up(_cdiv(n, 2), _LANE))

    # ---- resident-support path selection ---------------------------------
    def resident_need(bm_):
        return (2 * n * f_out_p * sup_item        # resident support (2 bufs)
                + 2 * bm_ * n * adj_item          # adj row slab, double-buffered
                + 2 * bm_ * f_out_p * out_item)   # output tile

    use_resident, bm = False, None
    if block_k is None:
        if block_m is not None:
            cand = _round_up(block_m, _LANE)
            if resident_need(cand) <= _VMEM_BUDGET:
                use_resident, bm = True, cand
        else:
            cand = min(1024, bm_cap)
            while cand > _LANE and resident_need(cand) > _VMEM_BUDGET:
                cand = max(_LANE, cand // 2)
            if resident_need(cand) <= _VMEM_BUDGET:
                use_resident, bm = True, cand

    if use_resident:
        support = _compute_support(x, weight_p, compute_dtype=cdt)  # (n, f_out_p)
        need = resident_need(bm)
        out = pl.pallas_call(
            _fused_resident_kernel,
            out_shape=jax.ShapeDtypeStruct((n, f_out_p), out_dtype),
            grid=(_cdiv(n, bm),),
            in_specs=[
                pl.BlockSpec((bm, n), lambda i: (i, 0)),          # adj row slab
                pl.BlockSpec((n, f_out_p), lambda i: (0, 0)),     # resident support
            ],
            out_specs=pl.BlockSpec((bm, f_out_p), lambda i: (i, 0)),
            compiler_params=pltpu.CompilerParams(
                dimension_semantics=("parallel",),
                vmem_limit_bytes=_vmem_limit(need),
            ),
            cost_estimate=pl.CostEstimate(
                flops=2 * n * n * f_out_p,
                transcendentals=0,
                bytes_accessed=(n * n * adj_item
                                + n * f_out_p * sup_item
                                + n * f_out_p * out_item),
            ),
        )(adj, support)
        return out[:, :f_out]

    # ---- tiled path (large graphs / forced tiling) ------------------------
    bn = min(f_out_p, 512) if block_n is None else min(_round_up(block_n, _LANE), f_out_p)
    bk = (_round_up(block_k, _LANE) if block_k is not None
          else min(_round_up(n, _LANE), 1024))
    bm = _round_up(block_m, _LANE) if block_m is not None else min(1024, bm_cap)

    def tiled_need(bm_, bk_, bn_):
        return (2 * bm_ * bk_ * adj_item          # adj tile, double-buffered
                + 2 * bk_ * bn_ * sup_item        # support tile, double-buffered
                + 2 * bm_ * bn_ * out_item        # output tile
                + bm_ * bn_ * 4)                  # f32 accumulator

    while tiled_need(bm, bk, bn) > _VMEM_BUDGET:
        if block_k is None and bk > 512:
            bk //= 2
        elif block_m is None and bm > _LANE:
            bm //= 2
        elif block_n is None and bn > _LANE:
            bn //= 2
        elif block_k is None and bk > _LANE:
            bk //= 2
        else:
            break

    n_pad_k = _round_up(n, bk)
    # Row-pad x (cheap, linear in N) so padded support rows are exact zeros;
    # adj itself stays untouched in HBM.
    x_p = jnp.pad(x, ((0, n_pad_k - n), (0, 0))) if n_pad_k != n else x
    support = _compute_support(x_p, weight_p, compute_dtype=cdt)  # (n_pad_k, f_out_p)

    need = tiled_need(bm, bk, bn)
    grid = (_cdiv(n, bm), _cdiv(f_out_p, bn), n_pad_k // bk)
    kernel = functools.partial(_fused_tiled_kernel, n_cols=n, block_k=bk)

    out = pl.pallas_call(
        kernel,
        out_shape=jax.ShapeDtypeStruct((n, f_out_p), out_dtype),
        grid=grid,
        in_specs=[
            pl.BlockSpec((bm, bk), lambda i, j, k: (i, k)),
            pl.BlockSpec((bk, bn), lambda i, j, k: (k, j)),
        ],
        out_specs=pl.BlockSpec((bm, bn), lambda i, j, k: (i, j)),
        scratch_shapes=[pltpu.VMEM((bm, bn), jnp.float32)],
        compiler_params=pltpu.CompilerParams(
            dimension_semantics=("parallel", "parallel", "arbitrary"),
            vmem_limit_bytes=_vmem_limit(need),
        ),
        cost_estimate=pl.CostEstimate(
            flops=2 * n * n_pad_k * f_out_p,
            transcendentals=0,
            bytes_accessed=(n * n * adj_item
                            + _cdiv(n, bm) * n_pad_k * f_out_p * sup_item
                            + n * f_out_p * out_item),
        ),
    )(adj, support)
    return out[:, :f_out]


# ---------------------------------------------------------------------------
# Self-test
# ---------------------------------------------------------------------------
if __name__ == "__main__":
    def make_inputs(key, n, f_in, f_out):
        kx, kadj, kw = jax.random.split(key, 3)
        x = jax.random.normal(kx, (n, f_in), dtype=jnp.float32)
        a = jax.random.uniform(kadj, (n, n), dtype=jnp.float32)
        a = (a + a.T) * 0.5 + jnp.eye(n, dtype=jnp.float32)
        adj = a / jnp.sum(a, axis=1, keepdims=True)          # row-normalized
        bound = jnp.sqrt(6.0 / (f_in + f_out))               # xavier uniform
        w = jax.random.uniform(kw, (f_in, f_out), jnp.float32, -bound, bound)
        return x, adj, w

    def ref_bf16(x, adj, w):
        sup = jnp.dot(x.astype(jnp.bfloat16), w.astype(jnp.bfloat16),
                      preferred_element_type=jnp.float32).astype(jnp.bfloat16)
        out = jnp.dot(adj.astype(jnp.bfloat16), sup,
                      preferred_element_type=jnp.float32)
        return jnp.maximum(out, 0.0)

    key = jax.random.PRNGKey(0)
    k1, k2 = jax.random.split(key)

    # Case 1: aligned shapes. Auto path keeps support VMEM-resident; forcing
    # block_m/block_k exercises the tiled accumulator kernel (grid (2,1,2)).
    N1, FI1, FO1 = 256, 64, 96
    x1, adj1, w1 = make_inputs(k1, N1, FI1, FO1)
    out_res = jax.block_until_ready(graph_convolution(x1, adj1, w1))
    out_tile = jax.block_until_ready(
        graph_convolution(x1, adj1, w1, block_m=128, block_k=128))
    assert out_res.shape == (N1, FO1) and out_tile.shape == (N1, FO1)
    r1 = ref_bf16(x1, adj1, w1)
    assert jnp.allclose(out_res, r1, atol=5e-3, rtol=5e-3)
    assert jnp.allclose(out_tile, r1, atol=5e-3, rtol=5e-3)
    r1_f32 = jnp.maximum(adj1 @ (x1 @ w1), 0.0)
    assert float(jnp.max(jnp.abs(out_res - r1_f32))) < 5e-2

    # Case 2: ragged node / feature counts (exercises Pallas boundary masking
    # on the row axis and the in-kernel K-tail mask; adj is never padded).
    N2, FI2, FO2 = 200, 48, 80
    x2, adj2, w2 = make_inputs(k2, N2, FI2, FO2)
    out2_res = jax.block_until_ready(graph_convolution(x2, adj2, w2))
    out2_tile = jax.block_until_ready(
        graph_convolution(x2, adj2, w2, block_m=128, block_k=128))
    assert out2_res.shape == (N2, FO2) and out2_tile.shape == (N2, FO2)
    r2 = ref_bf16(x2, adj2, w2)
    assert jnp.allclose(out2_res, r2, atol=5e-3, rtol=5e-3)
    assert jnp.allclose(out2_tile, r2, atol=5e-3, rtol=5e-3)

    print("KERNEL_OK")
</pallas_src>

<mosaic_0001>
module attributes {stable_mosaic.version = 11 : i64} {
  func.func @_support_kernel(%arg0: i32, %arg1: memref<256x64xf32, #tpu.memory_space<vmem>>, %arg2: memref<64x128xbf16, #tpu.memory_space<vmem>>, %arg3: memref<256x128xbf16, #tpu.memory_space<vmem>>) attributes {dimension_semantics = [#tpu.dimension_semantics<parallel>], iteration_bounds = array<i64: 1>, scalar_prefetch = 0 : i64, scratch_operands = 0 : i64, tpu.core_type = #tpu.core_type<tc>, window_params = [{transform_indices = @transform_0, window_bounds = array<i64: 256, 64>}, {pipeline_mode = #tpu.pipeline_mode<synchronous>, transform_indices = @transform_1, window_bounds = array<i64: 64, 128>}, {transform_indices = @transform_2, window_bounds = array<i64: 256, 128>}]} {
    %c0 = arith.constant 0 : index
    %c0_0 = arith.constant 0 : index
    %0 = vector.load %arg1[%c0, %c0_0] : memref<256x64xf32, #tpu.memory_space<vmem>>, vector<256x64xf32>
    %1 = arith.truncf %0 : vector<256x64xf32> to vector<256x64xbf16>
    %c0_1 = arith.constant 0 : index
    %c0_2 = arith.constant 0 : index
    %2 = vector.load %arg2[%c0_1, %c0_2] : memref<64x128xbf16, #tpu.memory_space<vmem>>, vector<64x128xbf16>
    %cst = arith.constant dense<0.000000e+00> : vector<256x128xf32>
    %3 = tpu.matmul %1, %2, %cst {dimension_numbers = #tpu.dot_dimension_numbers<[1], [0], [0], [1], [0, 0, 1, 1], [], []>} : vector<256x64xbf16>, vector<64x128xbf16>, vector<256x128xf32> -> vector<256x128xf32>
    %4 = arith.truncf %3 : vector<256x128xf32> to vector<256x128xbf16>
    %c0_3 = arith.constant 0 : index
    %c0_4 = arith.constant 0 : index
    %5 = vector.load %arg3[%c0_3, %c0_4] : memref<256x128xbf16, #tpu.memory_space<vmem>>, vector<256x128xbf16>
    tpu.vector_store %arg3[%c0_3, %c0_4], %4 {strides = array<i32>} : memref<256x128xbf16, #tpu.memory_space<vmem>>, vector<256x128xbf16>,
    return
  }
  func.func @transform_0(%arg0: i32) -> (i32, i32) {
    %c0_i32 = arith.constant 0 : i32
    %c0_i32_0 = arith.constant 0 : i32
    return %arg0, %c0_i32 : i32, i32
  }
  func.func @transform_1(%arg0: i32) -> (i32, i32) {
    %c0_i32 = arith.constant 0 : i32
    %c0_i32_0 = arith.constant 0 : i32
    %c0_i32_1 = arith.constant 0 : i32
    return %c0_i32, %c0_i32_0 : i32, i32
  }
  func.func @transform_2(%arg0: i32) -> (i32, i32) {
    %c0_i32 = arith.constant 0 : i32
    %c0_i32_0 = arith.constant 0 : i32
    return %arg0, %c0_i32 : i32, i32
  }
}

</mosaic_0001>

<bundles_post_ra>
// kernel: tpu_custom_call.1
= control target key start
LH: loop header
LB: loop body
LE: loop exit
PB: predicated region body
PF: predicated region fallthrough
CT: control target
= control target key end

     0   :  { %vm93_vm0 = vcmask 523264   ;;  %s911_s0 = inlined_call_operand.vmem [shape: f32[256,64], index: 0, kind: input, shape index: {}]   ;;  %s912_s1 = inlined_call_operand.vmem [shape: bf16[64,128], index: 1, kind: input, shape index: {}]   ;;  %s913_s2 = inlined_call_operand.hbm [shape: bf16[256,128], index: 2, kind: output, shape index: {}]  }
   0x1   :  { %v729_v0 = vld [vmem:[%s912_s1] sm:$0xff]   ;;  %v730_v1 = vld [vmem:[%s912_s1 + $0x8] sm:$0xff]   ;;  %v731_v2 = vld [vmem:[%s912_s1 + $0x10] sm:$0xff]  }
   0x2   :  { %678 = vmatprep.subr.bf16.mxu0 %v729_v0  ;;  %718 = vmatprep.subr.bf16.mxu1 %v729_v0  ;;  %v13_v3 = vld [vmem:[%s911_s0] sm:$0xff]  ;;  %v14_v4 = vld [vmem:[%s911_s0 + $0x8] sm:$0xff]  ;;  %v732_v9 = vld [vmem:[%s912_s1 + $0x18] sm:$0xff]  }
   0x3   :  { %679 = vmatpush3.bf16.msra.mxu0 %v729_v0  ;;  %722 = vmatpush3.bf16.msra.mxu1 %v729_v0  ;;  %v29_v5 = vld [vmem:[%s911_s0 + $0x80] sm:$0xff]  ;;  %v45_v6 = vpack.c.bf16 %v14_v4, %v13_v3  ;;  %v30_v7 = vld [vmem:[%s911_s0 + $0x88] sm:$0xff]  ;;  %v15_v10 = vld [vmem:[%s911_s0 + $0x10] sm:$0xff] }
   0x4   :  { %680 = vmatprep.subr.bf16.mxu0 %v730_v1  ;;  %719 = vmatprep.subr.bf16.mxu1 %v730_v1  ;;  %v53_v8 = vpack.c.bf16 %v30_v7, %v29_v5  ;;  %v16_v11 = vld [vmem:[%s911_s0 + $0x18] sm:$0xff]  ;;  %v31_v12 = vld [vmem:[%s911_s0 + $0x90] sm:$0xff]  ;;  %v17_v14 = vld [vmem:[%s911_s0 + $0x20] sm:$0xff] }
   0x5   :  { %686 = vmatprep.mubr.msk.bf16.mxu0 %vm93_vm0, %v45_v6  ;;  %v32_v13 = vld [vmem:[%s911_s0 + $0x98] sm:$0xff]  ;;  %v18_v15 = vld [vmem:[%s911_s0 + $0x28] sm:$0xff]  ;;  %v33_v16 = vld [vmem:[%s911_s0 + $0xa0] sm:$0xff]  ;;  %v46_v18 = vpack.c.bf16 %v16_v11, %v15_v10 }
   0x6   :  { %702 = vmatprep.mubr.msk.bf16.mxu1 %vm93_vm0, %v53_v8  ;;  %v34_v17 = vld [vmem:[%s911_s0 + $0xa8] sm:$0xff]  ;;  %v54_v19 = vpack.c.bf16 %v32_v13, %v31_v12 }
   0x7   :  { %681 = vmatpush3.bf16.msra.mxu0 %v730_v1  ;;  %723 = vmatpush3.bf16.msra.mxu1 %v730_v1 }
   0x8   :  { %682 = vmatprep.subr.bf16.mxu0 %v731_v2  ;;  %720 = vmatprep.subr.bf16.mxu1 %v731_v2 }
   0xb   :  { %683 = vmatpush3.bf16.msra.mxu0 %v731_v2  ;;  %724 = vmatpush3.bf16.msra.mxu1 %v731_v2 }
   0xc   :  { %684 = vmatprep.subr.bf16.mxu0 %v732_v9  ;;  %721 = vmatprep.subr.bf16.mxu1 %v732_v9 }
   0xd   :  { %7 = vsyncpa [#allocation3], 0  ;;  %v47_v20 = vpack.c.bf16 %v18_v15, %v17_v14  ;;  %v55_v21 = vpack.c.bf16 %v34_v17, %v33_v16  ;;  %v19_v22 = vld [vmem:[%s911_s0 + $0x30] sm:$0xff]  ;;  %v20_v23 = vld [vmem:[%s911_s0 + $0x38] sm:$0xff] }
   0xe   :  { %v35_v24 = vld [vmem:[%s911_s0 + $0xb0] sm:$0xff]  ;;  %v36_v25 = vld [vmem:[%s911_s0 + $0xb8] sm:$0xff]  ;;  %v21_v26 = vld [vmem:[%s911_s0 + $0x40] sm:$0xff]  ;;  %v48_v30 = vpack.c.bf16 %v20_v23, %v19_v22 }
   0xf   :  { %685 = vmatpush3.bf16.msra.mxu0 %v732_v9  ;;  %725 = vmatpush3.bf16.msra.mxu1 %v732_v9  ;;  %v22_v27 = vld [vmem:[%s911_s0 + $0x48] sm:$0xff]  ;;  %v37_v28 = vld [vmem:[%s911_s0 + $0xc0] sm:$0xff]  ;;  %v56_v31 = vpack.c.bf16 %v36_v25, %v35_v24  ;;  %v23_v34 = vld [vmem:[%s911_s0 + $0x50] sm:$0xff] }
  0x10   :  { %v38_v29 = vld [vmem:[%s911_s0 + $0xc8] sm:$0xff]  ;;  %v49_v32 = vpack.c.bf16 %v22_v27, %v21_v26  ;;  %v24_v35 = vld [vmem:[%s911_s0 + $0x58] sm:$0xff]  ;;  %v39_v36 = vld [vmem:[%s911_s0 + $0xd0] sm:$0xff] }
  0x11   :  { %v57_v33 = vpack.c.bf16 %v38_v29, %v37_v28  ;;  %v40_v37 = vld [vmem:[%s911_s0 + $0xd8] sm:$0xff]  ;;  %v25_v38 = vld [vmem:[%s911_s0 + $0x60] sm:$0xff]  ;;  %v26_v39 = vld [vmem:[%s911_s0 + $0x68] sm:$0xff]  ;;  %v50_v42 = vpack.c.bf16 %v24_v35, %v23_v34 }
  0x12   :  { %687 = vmatmul.mubr.msk.bf16.vlgmr.msra.gmra.mrb[0].mxu0 %vm93_vm0, %v46_v18  ;;  %703 = vmatmul.mubr.msk.bf16.vlgmr.msra.gmra.mrb[0].mxu1 %vm93_vm0, %v54_v19  ;;  %v41_v40 = vld [vmem:[%s911_s0 + $0xe0] sm:$0xff]  ;;  %v42_v41 = vld [vmem:[%s911_s0 + $0xe8] sm:$0xff]  ;;  %v58_v43 = vpack.c.bf16 %v40_v37, %v39_v36  ;;  %v51_v44 = vpack.c.bf16 %v26_v39, %v25_v38  ;;  %v27_v46 = vld [vmem:[%s911_s0 + $0x70] sm:$0xff] }
  0x13   :  { %690 = vmatprep.mubr.msk.bf16.mxu0 %vm93_vm0, %v47_v20  ;;  %706 = vmatprep.mubr.msk.bf16.mxu1 %vm93_vm0, %v55_v21  ;;  %v59_v45 = vpack.c.bf16 %v42_v41, %v41_v40  ;;  %v28_v47 = vld [vmem:[%s911_s0 + $0x78] sm:$0xff]  ;;  %v43_v48 = vld [vmem:[%s911_s0 + $0xf0] sm:$0xff] }
  0x14   :  { %v44_v49 = vld [vmem:[%s911_s0 + $0xf8] sm:$0xff]  ;;  %v52_v50 = vpack.c.bf16 %v28_v47, %v27_v46  ;;  %s757_s0 = smov [#allocation2]  }
  0x15   :  { %v60_v51 = vpack.c.bf16 %v44_v49, %v43_v48  ;;  %s468_s23 = sshll.u32 %s757_s0, 4  ;;  %s469_s23 = int_to_ptr.vmem [resolvable:$true] %s468_s23 }
  0x16   :  { %s733_s24 = scalar_lea.vmem %s469_s23, 2048  ;;  %p738_p1 = scmp.lt.s32.totalorder %s469_s23, %s469_s23 }
  0x17   :  { %p734_p0 = scmp.ne.s32.totalorder %s469_s23, %s733_s24  ;;  %p739_p2 = scmp.lt.s32.totalorder %s733_s24, %s733_s24 }
  0x19   :  { %p740_p3 = por %p739_p2, %p738_p1 }
  0x1a   :  { %691 = vmatmul.mubr.msk.bf16.gmra.mrb[4].mxu0 %vm93_vm0, %v48_v30  ;;  %707 = vmatmul.mubr.msk.bf16.gmra.mrb[4].mxu1 %vm93_vm0, %v56_v31 }
  0x1b   :  { %694 = vmatprep.mubr.msk.bf16.mxu0 %vm93_vm0, %v49_v32  ;;  %710 = vmatprep.mubr.msk.bf16.mxu1 %vm93_vm0, %v57_v33  ;;  %p741_p4 = pnand %p740_p3, %p734_p0 }
  0x22   :  { %695 = vmatmul.mubr.msk.bf16.gmra.mrb[8].mxu0 %vm93_vm0, %v50_v42  ;;  %711 = vmatmul.mubr.msk.bf16.gmra.mrb[8].mxu1 %vm93_vm0, %v58_v43 }
  0x23   :  { %698 = vmatprep.mubr.msk.bf16.mxu0 %vm93_vm0, %v51_v44  ;;  %714 = vmatprep.mubr.msk.bf16.mxu1 %vm93_vm0, %v59_v45 }
  0x2a   :  { %699 = vmatmul.mubr.msk.bf16.gmra.mrb[12].mxu0 %vm93_vm0, %v52_v50  ;;  %715 = vmatmul.mubr.msk.bf16.gmra.mrb[12].mxu1 %vm93_vm0, %v60_v51 }
  0xe5   :  { %v688_v52 = vpop.f32.mrb[0].mxu0  ;;  %v704_v53 = vpop.f32.mrb[0].mxu1 }
  0xe6   :  { %v176_v54 = vpop.f32.mrb[1].mxu0  ;;  %v240_v55 = vpop.f32.mrb[1].mxu1 }
  0xe7   :  { %v689_v56 = vpop.f32.mrb[2].mxu0  ;;  %v705_v57 = vpop.f32.mrb[2].mxu1 }
  0xe8   :  { %v571_v58 = vpack.c.bf16 %v689_v56, %v688_v52  ;;  %v611_v59 = vpack.c.bf16 %v705_v57, %v704_v53  ;;  %v179_v60 = vpop.f32.mrb[3].mxu0  ;;  %v243_v61 = vpop.f32.mrb[3].mxu1 }
  0xe9   :  { %v566_v62 = vpack.c.bf16 %v179_v60, %v176_v54  ;;  %v606_v63 = vpack.c.bf16 %v243_v61, %v240_v55 }
  0xea   :  { %643 = vst [vmem:[#allocation2 + $0x8] sm:$0xff] %v571_v58   ;;  %651 = vst [vmem:[#allocation2 + $0x48] sm:$0xff] %v611_v59  }
  0xeb   :  { %567 = vst [vmem:[#allocation2] sm:$0xff] %v566_v62   ;;  %650 = vst [vmem:[#allocation2 + $0x40] sm:$0xff] %v606_v63  }
  0xed   :  { %v692_v0 = vpop.f32.mrb[4].mxu0  ;;  %v708_v1 = vpop.f32.mrb[4].mxu1 }
  0xee   :  { %v192_v2 = vpop.f32.mrb[5].mxu0  ;;  %v256_v3 = vpop.f32.mrb[5].mxu1 }
  0xef   :  { %v693_v4 = vpop.f32.mrb[6].mxu0  ;;  %v709_v5 = vpop.f32.mrb[6].mxu1 }
  0xf0   :  { %v581_v6 = vpack.c.bf16 %v693_v4, %v692_v0  ;;  %v621_v7 = vpack.c.bf16 %v709_v5, %v708_v1  ;;  %v195_v8 = vpop.f32.mrb[7].mxu0  ;;  %v259_v9 = vpop.f32.mrb[7].mxu1 }
  0xf1   :  { %v576_v10 = vpack.c.bf16 %v195_v8, %v192_v2  ;;  %v616_v11 = vpack.c.bf16 %v259_v9, %v256_v3 }
  0xf2   :  { %645 = vst [vmem:[#allocation2 + $0x18] sm:$0xff] %v581_v6   ;;  %653 = vst [vmem:[#allocation2 + $0x58] sm:$0xff] %v621_v7  }
  0xf3   :  { %644 = vst [vmem:[#allocation2 + $0x10] sm:$0xff] %v576_v10   ;;  %652 = vst [vmem:[#allocation2 + $0x50] sm:$0xff] %v616_v11  }
  0xf5   :  { %v696_v12 = vpop.f32.mrb[8].mxu0  ;;  %v712_v13 = vpop.f32.mrb[8].mxu1 }
  0xf6   :  { %v208_v14 = vpop.f32.mrb[9].mxu0  ;;  %v272_v15 = vpop.f32.mrb[9].mxu1 }
  0xf7   :  { %v697_v16 = vpop.f32.mrb[10].mxu0  ;;  %v713_v17 = vpop.f32.mrb[10].mxu1 }
  0xf8   :  { %v591_v18 = vpack.c.bf16 %v697_v16, %v696_v12  ;;  %v631_v19 = vpack.c.bf16 %v713_v17, %v712_v13  ;;  %v211_v20 = vpop.f32.mrb[11].mxu0  ;;  %v275_v21 = vpop.f32.mrb[11].mxu1 }
  0xf9   :  { %v586_v22 = vpack.c.bf16 %v211_v20, %v208_v14  ;;  %v626_v23 = vpack.c.bf16 %v275_v21, %v272_v15 }
  0xfa   :  { %647 = vst [vmem:[#allocation2 + $0x28] sm:$0xff] %v591_v18   ;;  %655 = vst [vmem:[#allocation2 + $0x68] sm:$0xff] %v631_v19  }
  0xfb   :  { %646 = vst [vmem:[#allocation2 + $0x20] sm:$0xff] %v586_v22   ;;  %654 = vst [vmem:[#allocation2 + $0x60] sm:$0xff] %v626_v23  }
  0xfd   :  { %v700_v24 = vpop.f32.mrb[12].mxu0  ;;  %v716_v25 = vpop.f32.mrb[12].mxu1 }
  0xfe   :  { %v224_v26 = vpop.f32.mrb[13].mxu0  ;;  %v288_v27 = vpop.f32.mrb[13].mxu1 }
  0xff   :  { %v701_v28 = vpop.f32.mrb[14].mxu0  ;;  %v717_v29 = vpop.f32.mrb[14].mxu1 }
 0x100   :  { %v601_v30 = vpack.c.bf16 %v701_v28, %v700_v24  ;;  %v641_v31 = vpack.c.bf16 %v717_v29, %v716_v25  ;;  %v227_v32 = vpop.f32.mrb[15].mxu0  ;;  %v291_v33 = vpop.f32.mrb[15].mxu1 }
 0x101   :  { %v596_v34 = vpack.c.bf16 %v227_v32, %v224_v26  ;;  %v636_v35 = vpack.c.bf16 %v291_v33, %v288_v27 }
 0x102   :  { %649 = vst [vmem:[#allocation2 + $0x38] sm:$0xff] %v601_v30   ;;  %657 = vst [vmem:[#allocation2 + $0x78] sm:$0xff] %v641_v31  }
 0x103   :  { %648 = vst [vmem:[#allocation2 + $0x30] sm:$0xff] %v596_v34   ;;  %656 = vst [vmem:[#allocation2 + $0x70] sm:$0xff] %v636_v35  }
 0x104   :  { %744 = shalt.err (!%p741_p4)
}
 0x105   :  { %s745_s27 = scalar_lea.hbm %s913_s2, 2048 }
 0x106   :  { %p746_p5 = scmp.ne.s32.totalorder %s913_s2, %s745_s27  ;;  %p749_p6 = scmp.lt.u32.totalorder %s745_s27, %s913_s2 }
 0x108   :  { %p751_p7 = pnand %p749_p6, %p746_p5 }
 0x10a   :  { %754 = shalt.err (!%p751_p7)
}
 0x10b   :  { %s758_s1 = smov 64   ;;  %s759_s4 = smov 4  }
 0x10c   :  { %474 = dma.vmem_to_hbm [thread:$0]  %s469_s23, 2048, %s913_s2, [#allocation3], %s758_s1, %s758_s1, %s759_s4  }
 0x10d   :  { %755 = dma.done.wait [#allocation3], 2048  }
 0x10e   :  { %756 = vsyncadd [#allocation3], 4294965248 }
 0x10f   :  { %478 = vsyncpa [#allocation3], 1 }

</bundles_post_ra>
